<compile_context>
chip_gen: v7x
topology: tpu7x:2x2x1
jax: 0.10.0
libtpu: 0.0.40
codegen_flags: <defaults>
</compile_context>

<pallas_src>
import math
import functools

import jax
import jax.numpy as jnp
import numpy as np
from jax import lax
from jax.experimental import pallas as pl
from jax.experimental.pallas import tpu as pltpu


_VMEM_LIMIT = 32 * 1024 * 1024  # TODO(synk): size to the actual blocks for production T.


# ----------------------- relative-position shift helpers ----------------------

def _rel_shift_roll(bd, T, q0, num_q_tiles):
    """bd: [Tq, 2T] -> out[r, j] = bd[r, j - (q0 + r) + (T - 1)], out: [Tq, T].

    Strided XLU rotate with a static base shift of (T + 1): row r is rotated by
    (T + 1 + r) mod 2T, which lines the wanted diagonal band up in columns [0, T)
    (after an optional dynamic lane rotate by the q-tile offset q0).  The final
    slice is a lane-aligned prefix slice of an even-width (2T) tensor.
    """
    rolled = pltpu.roll(bd, T + 1, 1, stride=1, stride_axis=0)
    if num_q_tiles > 1:
        # TODO(synk): the dynamic (traced) shift path is only exercised at production
        # T (test shapes use a single q tile with a fully static shift).
        rolled = pltpu.roll(rolled, q0, 1)
    return rolled[:, :T]


def _rel_shift_fallback(bd, T, q0, Tq):
    """Roll-free fallback: one row slice per query row, O(Tq*T) total."""
    rows = []
    for r in range(Tq):
        start = T - 1 - r - q0          # always within [0, T-1]
        rows.append(lax.dynamic_slice_in_dim(bd[r:r + 1, :], start, T, axis=1))
    return jnp.concatenate(rows, axis=0)


@functools.lru_cache(maxsize=None)
def _strided_roll_ok():
    """One-time probe: pltpu.roll(x, s, axis=1, stride=1, stride_axis=0) must rotate
    row i by (s + i) in the jnp.roll sense.  Otherwise use the slice fallback."""
    R, n, s = 8, 16, 9
    x = jnp.tile(jnp.arange(n, dtype=jnp.float32)[None, :], (R, 1))

    def kern(x_ref, o_ref):
        o_ref[...] = pltpu.roll(x_ref[...], s, 1, stride=1, stride_axis=0)

    try:
        y = pl.pallas_call(kern, out_shape=jax.ShapeDtypeStruct((R, n), jnp.float32))(x)
        y = np.asarray(jax.block_until_ready(y))
    except Exception:
        return False
    want = np.stack([np.roll(np.arange(n, dtype=np.float32), s + i) for i in range(R)])
    return bool(np.array_equal(y, want))


# --------------------------------- kernels -------------------------------------

def _qkv_proj_kernel(x_ref, w_ref, b_ref, q_ref, k_ref, v_ref, *, n_heads, d_k):
    """Fused QKV projection with head-major outputs.  The q columns / bias are
    pre-scaled by 1/sqrt(d_k) on the host so the [Tq, T] scores are never rescaled."""
    D = n_heads * d_k
    proj = jnp.dot(x_ref[0], w_ref[...],
                   preferred_element_type=jnp.float32) + b_ref[...]
    # Head scatter: a pure layout copy paid ONCE per batch step; the attention kernel
    # then loads contiguous [*, d_k] tiles directly via its BlockSpecs.
    for h in range(n_heads):
        lo = h * d_k
        q_ref[0, h] = proj[:, lo:lo + d_k].astype(q_ref.dtype)
        k_ref[0, h] = proj[:, D + lo:D + lo + d_k].astype(k_ref.dtype)
        v_ref[0, h] = proj[:, 2 * D + lo:2 * D + lo + d_k].astype(v_ref.dtype)


def _pos_proj_kernel(pos_ref, w_ref, p_ref, *, n_heads, d_k):
    """Positional projection, computed once per pos batch (NOT once per x batch step),
    head-major [nh, 2T, d_k].  The wrapper zero-pads pos to 2T rows, so bd gets an
    even lane width and its extra column is never read after the rel-shift."""
    proj = jnp.dot(pos_ref[0], w_ref[...], preferred_element_type=jnp.float32)
    for h in range(n_heads):
        p_ref[0, h] = proj[:, h * d_k:(h + 1) * d_k].astype(p_ref.dtype)


def _attn_kernel(q_ref, k_ref, v_ref, p_ref, posu_ref, posv_ref, mask_ref,
                 ctx_ref, w_ref, *,
                 T, Tq, num_q_tiles, use_roll, approx_recip, compute_dtype):
    """One (batch, head, q-tile) attention block.  Softmax math stays f32."""
    q = q_ref[0, 0].astype(jnp.float32)                 # [Tq, dk], pre-scaled
    k = k_ref[0, 0]                                     # [T,  dk]
    v = v_ref[0, 0]                                     # [T,  dk]
    p = p_ref[0, 0]                                     # [2T, dk]

    qu = (q + posu_ref[0]).astype(compute_dtype)        # posu/posv pre-scaled on host
    qv = (q + posv_ref[0]).astype(compute_dtype)

    dn = (((1,), (1,)), ((), ()))                       # contract d_k of both operands
    ac = lax.dot_general(qu, k, dn, preferred_element_type=jnp.float32)   # [Tq, T]
    bd = lax.dot_general(qv, p, dn, preferred_element_type=jnp.float32)   # [Tq, 2T]

    q0 = pl.multiple_of(pl.program_id(2) * Tq, Tq) if num_q_tiles > 1 else 0
    bd_shift = (_rel_shift_roll(bd, T, q0, num_q_tiles) if use_roll
                else _rel_shift_fallback(bd, T, q0, Tq))

    scores = ac + bd_shift
    keep = mask_ref[0] != 0                             # [1, T], broadcasts over rows
    # Finite fill instead of -inf keeps fully-masked rows NaN-free.
    scores = jnp.where(keep, scores, jnp.float32(-1e30))

    m = jnp.max(scores, axis=-1, keepdims=True)
    e = jnp.exp(scores - m)
    l = jnp.sum(e, axis=-1, keepdims=True)
    w = e * pl.reciprocal(l, approx=approx_recip)       # EUP slot, not a [Tq,T] divide

    w_ref[0, 0] = w.astype(w_ref.dtype)
    ctx_ref[0, 0] = jnp.dot(w.astype(compute_dtype), v,
                            preferred_element_type=jnp.float32).astype(ctx_ref.dtype)


# --------------------------------- wrapper --------------------------------------

def mhsa_relpos(x, mask, pos, params, n_heads, *,
                compute_dtype=jnp.bfloat16, q_tile=None,
                weights_dtype=jnp.float32):
    """Forward of MultiHeadedSelfAttentionWithRelPos (share_qvk_proj=False,
    dropout=0, no output projection).  Returns (context [B,T,D], weights [B,nh,T,T]).

    compute_dtype: MXU input dtype.  bf16 (default) for throughput + halved
    intermediate HBM traffic (accumulation always f32); jnp.float32 for exactness.
    weights_dtype: set to jnp.bfloat16 to halve the dominant weights writeback on
    mem-bound v5e/v6e when downstream tolerates it.
    """
    B, T, D = x.shape
    d_k = D // n_heads
    Bp = pos.shape[0]
    scale = 1.0 / math.sqrt(d_k)

    if q_tile is None:
        q_tile = 128 if T % 128 == 0 else T
    assert T % q_tile == 0
    nq = T // q_tile

    # One-time host-side parameter prep (tiny): fold 1/sqrt(d_k) into the q
    # projection and posu/posv, cast MXU operands to compute_dtype, pad pos to 2T.
    W, b = params["W_qvk"], params["b_qvk"]
    w_qvk = jnp.concatenate([W[:, :D] * scale, W[:, D:]], axis=1).astype(compute_dtype)
    b_qvk = jnp.concatenate([b[:D] * scale, b[D:]]).reshape(1, 3 * D).astype(jnp.float32)
    w_pos = params["W_pos"].astype(compute_dtype)
    posu = (params["posu"] * scale).reshape(n_heads, 1, d_k).astype(jnp.float32)
    posv = (params["posv"] * scale).reshape(n_heads, 1, d_k).astype(jnp.float32)
    x_c = x.astype(compute_dtype)
    pos_c = jnp.pad(pos, ((0, 0), (0, 1), (0, 0))).astype(compute_dtype)
    mask_i = mask.astype(jnp.int32)

    # --- 1. fused QKV projection -> head-major q(scaled)/k/v ----------------------
    qh, kh, vh = pl.pallas_call(
        functools.partial(_qkv_proj_kernel, n_heads=n_heads, d_k=d_k),
        grid=(B,),
        in_specs=[
            pl.BlockSpec((1, T, D), lambda i: (i, 0, 0)),
            pl.BlockSpec((D, 3 * D), lambda i: (0, 0)),
            pl.BlockSpec((1, 3 * D), lambda i: (0, 0)),
        ],
        out_specs=[pl.BlockSpec((1, n_heads, T, d_k), lambda i: (i, 0, 0, 0))] * 3,
        out_shape=[jax.ShapeDtypeStruct((B, n_heads, T, d_k), compute_dtype)] * 3,
        compiler_params=pltpu.CompilerParams(
            dimension_semantics=("parallel",), vmem_limit_bytes=_VMEM_LIMIT),
    )(x_c, w_qvk, b_qvk)

    # --- 2. pos projection, computed once (grid over pos batch, usually 1) --------
    ph = pl.pallas_call(
        functools.partial(_pos_proj_kernel, n_heads=n_heads, d_k=d_k),
        grid=(Bp,),
        in_specs=[
            pl.BlockSpec((1, 2 * T, D), lambda i: (i, 0, 0)),
            pl.BlockSpec((D, D), lambda i: (0, 0)),
        ],
        out_specs=pl.BlockSpec((1, n_heads, 2 * T, d_k), lambda i: (i, 0, 0, 0)),
        out_shape=jax.ShapeDtypeStruct((Bp, n_heads, 2 * T, d_k), compute_dtype),
        compiler_params=pltpu.CompilerParams(
            dimension_semantics=("parallel",), vmem_limit_bytes=_VMEM_LIMIT),
    )(pos_c, w_pos)

    # --- 3. attention: grid over (batch, head, q-tile), all parallel ---------------
    p_idx = ((lambda bi, h, qi: (bi, h, 0, 0)) if Bp > 1
             else (lambda bi, h, qi: (0, h, 0, 0)))
    kernel = functools.partial(
        _attn_kernel, T=T, Tq=q_tile, num_q_tiles=nq,
        use_roll=_strided_roll_ok(),
        approx_recip=(compute_dtype != jnp.float32),
        compute_dtype=compute_dtype)

    ctx_h, weights = pl.pallas_call(
        kernel,
        grid=(B, n_heads, nq),
        in_specs=[
            pl.BlockSpec((1, 1, q_tile, d_k), lambda bi, h, qi: (bi, h, qi, 0)),  # q
            pl.BlockSpec((1, 1, T, d_k), lambda bi, h, qi: (bi, h, 0, 0)),        # k
            pl.BlockSpec((1, 1, T, d_k), lambda bi, h, qi: (bi, h, 0, 0)),        # v
            pl.BlockSpec((1, 1, 2 * T, d_k), p_idx),                              # pos
            pl.BlockSpec((1, 1, d_k), lambda bi, h, qi: (h, 0, 0)),               # posu
            pl.BlockSpec((1, 1, d_k), lambda bi, h, qi: (h, 0, 0)),               # posv
            pl.BlockSpec((1, 1, T), lambda bi, h, qi: (bi, 0, 0)),                # mask
        ],
        out_specs=[
            pl.BlockSpec((1, 1, q_tile, d_k), lambda bi, h, qi: (bi, h, qi, 0)),  # ctx
            pl.BlockSpec((1, 1, q_tile, T), lambda bi, h, qi: (bi, h, qi, 0)),    # w
        ],
        out_shape=[
            jax.ShapeDtypeStruct((B, n_heads, T, d_k), jnp.float32),
            jax.ShapeDtypeStruct((B, n_heads, T, T), weights_dtype),
        ],
        compiler_params=pltpu.CompilerParams(
            dimension_semantics=("parallel", "parallel", "parallel"),
            vmem_limit_bytes=_VMEM_LIMIT),
    )(qh, kh, vh, ph, posu, posv, mask_i)

    # Head-major -> [B, T, D] (matches torch's transpose(1,2).reshape); plain-JAX
    # layout plumbing keeps the kernel's context stores full-tile.
    ctx = ctx_h.transpose(0, 2, 1, 3).reshape(B, T, D)
    # TODO(synk): add a flash-style key-tile axis (online softmax) for callers that
    # do not consume the [B, nh, T, T] attention weights.
    return ctx, weights


# ---------------------------- pure-JAX reference -------------------------------

def reference(x, mask, pos, params, n_heads):
    B, T, D = x.shape
    dk = D // n_heads
    T2 = 2 * T - 1
    Bp = pos.shape[0]
    with jax.default_matmul_precision("float32"):
        qkv = x @ params["W_qvk"] + params["b_qvk"]
        q, k, v = jnp.split(qkv, 3, axis=-1)
        q = q.reshape(B, T, n_heads, dk)
        kh = k.reshape(B, T, n_heads, dk).transpose(0, 2, 1, 3)
        vh = v.reshape(B, T, n_heads, dk).transpose(0, 2, 1, 3)
        ph = (pos @ params["W_pos"]).reshape(Bp, T2, n_heads, dk).transpose(0, 2, 1, 3)
        ph = jnp.broadcast_to(ph, (B, n_heads, T2, dk))

        qu = (q + params["posu"][None, None]).transpose(0, 2, 1, 3)
        qv = (q + params["posv"][None, None]).transpose(0, 2, 1, 3)

        ac = jnp.einsum('bhqd,bhkd->bhqk', qu, kh)
        bd = jnp.einsum('bhqd,bhkd->bhqk', qv, ph)

        rel = (jnp.arange(T)[None, :] - jnp.arange(T)[:, None]) + (T - 1)
        idx = jnp.broadcast_to(rel[None, None], (B, n_heads, T, T))
        bd_s = jnp.take_along_axis(bd, idx, axis=3)

        scores = (ac + bd_s) / math.sqrt(dk)
        scores = jnp.where(mask[:, None], scores, -jnp.inf)
        w = jax.nn.softmax(scores, axis=-1)
        ctx = jnp.einsum('bhqk,bhkd->bhqd', w, vh)
        ctx = ctx.transpose(0, 2, 1, 3).reshape(B, T, D)
    return ctx, w


# ----------------------------------- main ---------------------------------------

if __name__ == "__main__":
    B, T, D, nh = 2, 8, 32, 4
    dk = D // nh
    T2 = 2 * T - 1

    key = jax.random.PRNGKey(0)
    ks = jax.random.split(key, 8)
    xavier_std = math.sqrt(2.0 / (nh + dk))
    params = {
        "W_qvk": 0.1 * jax.random.normal(ks[0], (D, 3 * D), jnp.float32),
        "b_qvk": 0.1 * jax.random.normal(ks[1], (3 * D,), jnp.float32),
        "W_pos": 0.1 * jax.random.normal(ks[2], (D, D), jnp.float32),
        "posu": xavier_std * jax.random.normal(ks[3], (nh, dk), jnp.float32),
        "posv": xavier_std * jax.random.normal(ks[4], (nh, dk), jnp.float32),
    }

    x = jax.random.normal(ks[5], (B, T, D), jnp.float32)
    pos = jax.random.normal(ks[6], (1, T2, D), jnp.float32)
    lengths = jnp.array([T, T - 3], dtype=jnp.int32)
    mask = jnp.arange(T)[None, None, :] < lengths[:, None, None]   # [B, 1, T] bool

    ctx_exp, w_exp = reference(x, mask, pos, params, nh)

    # Exact-precision path (f32 MXU feed): validates the algorithm tightly.
    ctx32, w32 = mhsa_relpos(x, mask, pos, params, nh, compute_dtype=jnp.float32)
    jax.block_until_ready((ctx32, w32))
    np.testing.assert_allclose(np.asarray(ctx32), np.asarray(ctx_exp), rtol=1e-4, atol=1e-4)
    np.testing.assert_allclose(np.asarray(w32), np.asarray(w_exp), rtol=1e-4, atol=1e-4)

    # Production path (bf16 MXU inputs, f32 accumulation and softmax).
    ctxb, wb = mhsa_relpos(x, mask, pos, params, nh)
    jax.block_until_ready((ctxb, wb))
    np.testing.assert_allclose(np.asarray(ctxb), np.asarray(ctx_exp), rtol=3e-2, atol=3e-2)
    np.testing.assert_allclose(np.asarray(wb), np.asarray(w_exp), rtol=3e-2, atol=3e-2)

    print("KERNEL_OK")
</pallas_src>

<mosaic_0001>
module attributes {stable_mosaic.version = 11 : i64} {
  func.func @_qkv_proj_kernel(%arg0: i32, %arg1: memref<1x8x32xf32, #tpu.memory_space<vmem>>, %arg2: memref<32x96xf32, #tpu.memory_space<vmem>>, %arg3: memref<1x96xf32, #tpu.memory_space<vmem>>, %arg4: memref<1x4x8x8xf32, #tpu.memory_space<vmem>>, %arg5: memref<1x4x8x8xf32, #tpu.memory_space<vmem>>, %arg6: memref<1x4x8x8xf32, #tpu.memory_space<vmem>>) attributes {dimension_semantics = [#tpu.dimension_semantics<parallel>], iteration_bounds = array<i64: 2>, scalar_prefetch = 0 : i64, scratch_operands = 0 : i64, tpu.core_type = #tpu.core_type<tc>, window_params = [{transform_indices = @transform_0, window_bounds = array<i64: 1, 8, 32>}, {pipeline_mode = #tpu.pipeline_mode<synchronous>, transform_indices = @transform_1, window_bounds = array<i64: 32, 96>}, {pipeline_mode = #tpu.pipeline_mode<synchronous>, transform_indices = @transform_2, window_bounds = array<i64: 1, 96>}, {transform_indices = @transform_3, window_bounds = array<i64: 1, 4, 8, 8>}, {transform_indices = @transform_4, window_bounds = array<i64: 1, 4, 8, 8>}, {transform_indices = @transform_5, window_bounds = array<i64: 1, 4, 8, 8>}]} {
    %c0 = arith.constant 0 : index
    %c0_0 = arith.constant 0 : index
    %c0_1 = arith.constant 0 : index
    %0 = vector.load %arg1[%c0, %c0_0, %c0_1] : memref<1x8x32xf32, #tpu.memory_space<vmem>>, vector<1x8x32xf32>
    %1 = vector.shape_cast %0 : vector<1x8x32xf32> to vector<8x32xf32>
    %c0_2 = arith.constant 0 : index
    %c0_3 = arith.constant 0 : index
    %2 = vector.load %arg2[%c0_2, %c0_3] : memref<32x96xf32, #tpu.memory_space<vmem>>, vector<32x96xf32>
    %cst = arith.constant dense<0.000000e+00> : vector<8x96xf32>
    %3 = tpu.matmul %1, %2, %cst {dimension_numbers = #tpu.dot_dimension_numbers<[1], [0], [0], [1], [0, 0, 1, 1], [], []>} : vector<8x32xf32>, vector<32x96xf32>, vector<8x96xf32> -> vector<8x96xf32>
    %c0_4 = arith.constant 0 : index
    %c0_5 = arith.constant 0 : index
    %4 = vector.load %arg3[%c0_4, %c0_5] : memref<1x96xf32, #tpu.memory_space<vmem>>, vector<1x96xf32>
    %5 = vector.broadcast %4 : vector<1x96xf32> to vector<8x96xf32>
    %6 = arith.addf %3, %5 : vector<8x96xf32>
    %7 = vector.extract_strided_slice %6 {offsets = [0, 0], sizes = [8, 8], strides = [1, 1]} : vector<8x96xf32> to vector<8x8xf32>
    %c0_6 = arith.constant 0 : index
    %c0_7 = arith.constant 0 : index
    %c0_8 = arith.constant 0 : index
    %c0_9 = arith.constant 0 : index
    %8 = vector.load %arg4[%c0_6, %c0_7, %c0_8, %c0_9] : memref<1x4x8x8xf32, #tpu.memory_space<vmem>>, vector<1x1x8x8xf32>
    %9 = vector.shape_cast %8 : vector<1x1x8x8xf32> to vector<8x8xf32>
    %10 = vector.shape_cast %7 : vector<8x8xf32> to vector<1x1x8x8xf32>
    tpu.vector_store %arg4[%c0_6, %c0_7, %c0_8, %c0_9], %10 {strides = array<i32>} : memref<1x4x8x8xf32, #tpu.memory_space<vmem>>, vector<1x1x8x8xf32>,
    %11 = vector.extract_strided_slice %6 {offsets = [0, 32], sizes = [8, 8], strides = [1, 1]} : vector<8x96xf32> to vector<8x8xf32>
    %c0_10 = arith.constant 0 : index
    %c0_11 = arith.constant 0 : index
    %c0_12 = arith.constant 0 : index
    %c0_13 = arith.constant 0 : index
    %12 = vector.load %arg5[%c0_10, %c0_11, %c0_12, %c0_13] : memref<1x4x8x8xf32, #tpu.memory_space<vmem>>, vector<1x1x8x8xf32>
    %13 = vector.shape_cast %12 : vector<1x1x8x8xf32> to vector<8x8xf32>
    %14 = vector.shape_cast %11 : vector<8x8xf32> to vector<1x1x8x8xf32>
    tpu.vector_store %arg5[%c0_10, %c0_11, %c0_12, %c0_13], %14 {strides = array<i32>} : memref<1x4x8x8xf32, #tpu.memory_space<vmem>>, vector<1x1x8x8xf32>,
    %15 = vector.extract_strided_slice %6 {offsets = [0, 64], sizes = [8, 8], strides = [1, 1]} : vector<8x96xf32> to vector<8x8xf32>
    %c0_14 = arith.constant 0 : index
    %c0_15 = arith.constant 0 : index
    %c0_16 = arith.constant 0 : index
    %c0_17 = arith.constant 0 : index
    %16 = vector.load %arg6[%c0_14, %c0_15, %c0_16, %c0_17] : memref<1x4x8x8xf32, #tpu.memory_space<vmem>>, vector<1x1x8x8xf32>
    %17 = vector.shape_cast %16 : vector<1x1x8x8xf32> to vector<8x8xf32>
    %18 = vector.shape_cast %15 : vector<8x8xf32> to vector<1x1x8x8xf32>
    tpu.vector_store %arg6[%c0_14, %c0_15, %c0_16, %c0_17], %18 {strides = array<i32>} : memref<1x4x8x8xf32, #tpu.memory_space<vmem>>, vector<1x1x8x8xf32>,
    %19 = vector.extract_strided_slice %6 {offsets = [0, 8], sizes = [8, 8], strides = [1, 1]} : vector<8x96xf32> to vector<8x8xf32>
    %c0_18 = arith.constant 0 : index
    %c1 = arith.constant 1 : index
    %c0_19 = arith.constant 0 : index
    %c0_20 = arith.constant 0 : index
    %20 = vector.load %arg4[%c0_18, %c1, %c0_19, %c0_20] : memref<1x4x8x8xf32, #tpu.memory_space<vmem>>, vector<1x1x8x8xf32>
    %21 = vector.shape_cast %20 : vector<1x1x8x8xf32> to vector<8x8xf32>
    %22 = vector.shape_cast %19 : vector<8x8xf32> to vector<1x1x8x8xf32>
    tpu.vector_store %arg4[%c0_18, %c1, %c0_19, %c0_20], %22 {strides = array<i32>} : memref<1x4x8x8xf32, #tpu.memory_space<vmem>>, vector<1x1x8x8xf32>,
    %23 = vector.extract_strided_slice %6 {offsets = [0, 40], sizes = [8, 8], strides = [1, 1]} : vector<8x96xf32> to vector<8x8xf32>
    %c0_21 = arith.constant 0 : index
    %c1_22 = arith.constant 1 : index
    %c0_23 = arith.constant 0 : index
    %c0_24 = arith.constant 0 : index
    %24 = vector.load %arg5[%c0_21, %c1_22, %c0_23, %c0_24] : memref<1x4x8x8xf32, #tpu.memory_space<vmem>>, vector<1x1x8x8xf32>
    %25 = vector.shape_cast %24 : vector<1x1x8x8xf32> to vector<8x8xf32>
    %26 = vector.shape_cast %23 : vector<8x8xf32> to vector<1x1x8x8xf32>
    tpu.vector_store %arg5[%c0_21, %c1_22, %c0_23, %c0_24], %26 {strides = array<i32>} : memref<1x4x8x8xf32, #tpu.memory_space<vmem>>, vector<1x1x8x8xf32>,
    %27 = vector.extract_strided_slice %6 {offsets = [0, 72], sizes = [8, 8], strides = [1, 1]} : vector<8x96xf32> to vector<8x8xf32>
    %c0_25 = arith.constant 0 : index
    %c1_26 = arith.constant 1 : index
    %c0_27 = arith.constant 0 : index
    %c0_28 = arith.constant 0 : index
    %28 = vector.load %arg6[%c0_25, %c1_26, %c0_27, %c0_28] : memref<1x4x8x8xf32, #tpu.memory_space<vmem>>, vector<1x1x8x8xf32>
    %29 = vector.shape_cast %28 : vector<1x1x8x8xf32> to vector<8x8xf32>
    %30 = vector.shape_cast %27 : vector<8x8xf32> to vector<1x1x8x8xf32>
    tpu.vector_store %arg6[%c0_25, %c1_26, %c0_27, %c0_28], %30 {strides = array<i32>} : memref<1x4x8x8xf32, #tpu.memory_space<vmem>>, vector<1x1x8x8xf32>,
    %31 = vector.extract_strided_slice %6 {offsets = [0, 16], sizes = [8, 8], strides = [1, 1]} : vector<8x96xf32> to vector<8x8xf32>
    %c0_29 = arith.constant 0 : index
    %c2 = arith.constant 2 : index
    %c0_30 = arith.constant 0 : index
    %c0_31 = arith.constant 0 : index
    %32 = vector.load %arg4[%c0_29, %c2, %c0_30, %c0_31] : memref<1x4x8x8xf32, #tpu.memory_space<vmem>>, vector<1x1x8x8xf32>
    %33 = vector.shape_cast %32 : vector<1x1x8x8xf32> to vector<8x8xf32>
    %34 = vector.shape_cast %31 : vector<8x8xf32> to vector<1x1x8x8xf32>
    tpu.vector_store %arg4[%c0_29, %c2, %c0_30, %c0_31], %34 {strides = array<i32>} : memref<1x4x8x8xf32, #tpu.memory_space<vmem>>, vector<1x1x8x8xf32>,
    %35 = vector.extract_strided_slice %6 {offsets = [0, 48], sizes = [8, 8], strides = [1, 1]} : vector<8x96xf32> to vector<8x8xf32>
    %c0_32 = arith.constant 0 : index
    %c2_33 = arith.constant 2 : index
    %c0_34 = arith.constant 0 : index
    %c0_35 = arith.constant 0 : index
    %36 = vector.load %arg5[%c0_32, %c2_33, %c0_34, %c0_35] : memref<1x4x8x8xf32, #tpu.memory_space<vmem>>, vector<1x1x8x8xf32>
    %37 = vector.shape_cast %36 : vector<1x1x8x8xf32> to vector<8x8xf32>
    %38 = vector.shape_cast %35 : vector<8x8xf32> to vector<1x1x8x8xf32>
    tpu.vector_store %arg5[%c0_32, %c2_33, %c0_34, %c0_35], %38 {strides = array<i32>} : memref<1x4x8x8xf32, #tpu.memory_space<vmem>>, vector<1x1x8x8xf32>,
    %39 = vector.extract_strided_slice %6 {offsets = [0, 80], sizes = [8, 8], strides = [1, 1]} : vector<8x96xf32> to vector<8x8xf32>
    %c0_36 = arith.constant 0 : index
    %c2_37 = arith.constant 2 : index
    %c0_38 = arith.constant 0 : index
    %c0_39 = arith.constant 0 : index
    %40 = vector.load %arg6[%c0_36, %c2_37, %c0_38, %c0_39] : memref<1x4x8x8xf32, #tpu.memory_space<vmem>>, vector<1x1x8x8xf32>
    %41 = vector.shape_cast %40 : vector<1x1x8x8xf32> to vector<8x8xf32>
    %42 = vector.shape_cast %39 : vector<8x8xf32> to vector<1x1x8x8xf32>
    tpu.vector_store %arg6[%c0_36, %c2_37, %c0_38, %c0_39], %42 {strides = array<i32>} : memref<1x4x8x8xf32, #tpu.memory_space<vmem>>, vector<1x1x8x8xf32>,
    %43 = vector.extract_strided_slice %6 {offsets = [0, 24], sizes = [8, 8], strides = [1, 1]} : vector<8x96xf32> to vector<8x8xf32>
    %c0_40 = arith.constant 0 : index
    %c3 = arith.constant 3 : index
    %c0_41 = arith.constant 0 : index
    %c0_42 = arith.constant 0 : index
    %44 = vector.load %arg4[%c0_40, %c3, %c0_41, %c0_42] : memref<1x4x8x8xf32, #tpu.memory_space<vmem>>, vector<1x1x8x8xf32>
    %45 = vector.shape_cast %44 : vector<1x1x8x8xf32> to vector<8x8xf32>
    %46 = vector.shape_cast %43 : vector<8x8xf32> to vector<1x1x8x8xf32>
    tpu.vector_store %arg4[%c0_40, %c3, %c0_41, %c0_42], %46 {strides = array<i32>} : memref<1x4x8x8xf32, #tpu.memory_space<vmem>>, vector<1x1x8x8xf32>,
    %47 = vector.extract_strided_slice %6 {offsets = [0, 56], sizes = [8, 8], strides = [1, 1]} : vector<8x96xf32> to vector<8x8xf32>
    %c0_43 = arith.constant 0 : index
    %c3_44 = arith.constant 3 : index
    %c0_45 = arith.constant 0 : index
    %c0_46 = arith.constant 0 : index
    %48 = vector.load %arg5[%c0_43, %c3_44, %c0_45, %c0_46] : memref<1x4x8x8xf32, #tpu.memory_space<vmem>>, vector<1x1x8x8xf32>
    %49 = vector.shape_cast %48 : vector<1x1x8x8xf32> to vector<8x8xf32>
    %50 = vector.shape_cast %47 : vector<8x8xf32> to vector<1x1x8x8xf32>
    tpu.vector_store %arg5[%c0_43, %c3_44, %c0_45, %c0_46], %50 {strides = array<i32>} : memref<1x4x8x8xf32, #tpu.memory_space<vmem>>, vector<1x1x8x8xf32>,
    %51 = vector.extract_strided_slice %6 {offsets = [0, 88], sizes = [8, 8], strides = [1, 1]} : vector<8x96xf32> to vector<8x8xf32>
    %c0_47 = arith.constant 0 : index
    %c3_48 = arith.constant 3 : index
    %c0_49 = arith.constant 0 : index
    %c0_50 = arith.constant 0 : index
    %52 = vector.load %arg6[%c0_47, %c3_48, %c0_49, %c0_50] : memref<1x4x8x8xf32, #tpu.memory_space<vmem>>, vector<1x1x8x8xf32>
    %53 = vector.shape_cast %52 : vector<1x1x8x8xf32> to vector<8x8xf32>
    %54 = vector.shape_cast %51 : vector<8x8xf32> to vector<1x1x8x8xf32>
    tpu.vector_store %arg6[%c0_47, %c3_48, %c0_49, %c0_50], %54 {strides = array<i32>} : memref<1x4x8x8xf32, #tpu.memory_space<vmem>>, vector<1x1x8x8xf32>,
    return
  }
  func.func @transform_0(%arg0: i32) -> (i32, i32, i32) {
    %c0_i32 = arith.constant 0 : i32
    %c0_i32_0 = arith.constant 0 : i32
    %c0_i32_1 = arith.constant 0 : i32
    return %arg0, %c0_i32, %c0_i32_0 : i32, i32, i32
  }
  func.func @transform_1(%arg0: i32) -> (i32, i32) {
    %c0_i32 = arith.constant 0 : i32
    %c0_i32_0 = arith.constant 0 : i32
    %c0_i32_1 = arith.constant 0 : i32
    return %c0_i32, %c0_i32_0 : i32, i32
  }
  func.func @transform_2(%arg0: i32) -> (i32, i32) {
    %c0_i32 = arith.constant 0 : i32
    %c0_i32_0 = arith.constant 0 : i32
    %c0_i32_1 = arith.constant 0 : i32
    return %c0_i32, %c0_i32_0 : i32, i32
  }
  func.func @transform_3(%arg0: i32) -> (i32, i32, i32, i32) {
    %c0_i32 = arith.constant 0 : i32
    %c0_i32_0 = arith.constant 0 : i32
    %c0_i32_1 = arith.constant 0 : i32
    %c0_i32_2 = arith.constant 0 : i32
    return %arg0, %c0_i32, %c0_i32_0, %c0_i32_1 : i32, i32, i32, i32
  }
  func.func @transform_4(%arg0: i32) -> (i32, i32, i32, i32) {
    %c0_i32 = arith.constant 0 : i32
    %c0_i32_0 = arith.constant 0 : i32
    %c0_i32_1 = arith.constant 0 : i32
    %c0_i32_2 = arith.constant 0 : i32
    return %arg0, %c0_i32, %c0_i32_0, %c0_i32_1 : i32, i32, i32, i32
  }
  func.func @transform_5(%arg0: i32) -> (i32, i32, i32, i32) {
    %c0_i32 = arith.constant 0 : i32
    %c0_i32_0 = arith.constant 0 : i32
    %c0_i32_1 = arith.constant 0 : i32
    %c0_i32_2 = arith.constant 0 : i32
    return %arg0, %c0_i32, %c0_i32_0, %c0_i32_1 : i32, i32, i32, i32
  }
}

</mosaic_0001>

<bundles_post_ra>
// kernel: tpu_custom_call.1
= control target key start
LH: loop header
LB: loop body
LE: loop exit
PB: predicated region body
PF: predicated region fallthrough
CT: control target
= control target key end

     0   :  { %11 = vsyncpa [#allocation3], 0  ;;  %s1316_s0 = inlined_call_operand.hbm [shape: f32[2,8,32], index: 0, kind: input, shape index: {}]   ;;  %s1317_s1 = inlined_call_operand.hbm [shape: f32[32,96], index: 1, kind: input, shape index: {}]   ;;  %s1318_s2 = inlined_call_operand.vmem [shape: f32[1,96], index: 2, kind: input, shape index: {}]   ;;  %s1319_s3 = inlined_call_operand.hbm [shape: f32[2,4,8,8], index: 3, kind: output, shape index: {0}]   ;;  %s1320_s4 = inlined_call_operand.hbm [shape: f32[2,4,8,8], index: 4, kind: output, shape index: {1}]   ;;  %s1321_s5 = inlined_call_operand.hbm [shape: f32[2,4,8,8], index: 5, kind: output, shape index: {2}]  }
   0x1   :  { %13 = vsyncpa [#allocation3 + $0x1], 0 }
   0x2   :  { %14 = vsyncpa [#allocation6], 0 }
   0x3   :  { %15 = vsyncpa [#allocation4], 0 }
   0x4   :  { %17 = vsyncpa [#allocation4 + $0x1], 0 }
   0x5   :  { %18 = vsyncpa [#allocation9], 0 }
   0x6   :  { %20 = vsyncpa [#allocation9 + $0x1], 0  ;;  %s1002_s18 = smov 0   ;;  %s1004_s19 = smov 0  }
   0x7   :  { %s1006_s20 = smov 0   ;;  %s1008_s21 = smov 0  }
   0x8 LB: > { %s1023_s22 = sadd.s32 4294967295, %s947_s21   ;;  %s1325_s23 = sadd.s32 4294967294, %s947_s21   ;;  %s947_s21 = sphi %s1008_s21, %s1344_s21   ;;  %s943_s20 = sphi %s1006_s20, %s1343_s20   ;;  %s939_s19 = sphi %s1004_s19, %s1342_s19   ;;  %s935_s18 = sphi %s1002_s18, %s1341_s18  }
   0x9   : > { %p46_p0 = scmp.ne.s32.totalorder %s939_s19, %s935_s18  ;;  %p1322_p1 = scmp.eq.s32.totalorder %s1023_s22, 0 }
   0xa   : > { %p118_p3 = scmp.eq.s32.totalorder %s1325_s23, 1  ;;  %p616_p5 = scmp.ge.s32.totalorder %s947_s21, 1 }
   0xb   : > { %p1034_p4 = por %p1322_p1, %p46_p0  ;;  %p177_p7 = scmp.lt.s32.totalorder %s947_s21, 3 }
   0xc   : > { %p1039_p6 = por %p118_p3, %p46_p0  ;;  %s949_s27 = smov [#allocation5]  }
   0xd   : > { %s1326_s24 = scalar_select %p1034_p4, 1, 0 }
   0xe   : > { %s1327_s25 = scalar_select %p1039_p6, 1, 0 }
   0xf   : > { %p1044_p8 = pnand %p616_p5, %p177_p7  ;;  %s189_s28 = sshll.u32 %s949_s27, 4  ;;  %s1048_s28 = int_to_ptr.vmem [resolvable:$true] %s189_s28 }
  0x10   : > { %s1060_s30 = sadd.s32 1, %s947_s21   ;;  %s33_s6 = sadd.s32 1, %s943_s20 }
  0x11   : > { %s1328_s26 = scalar_select %p1044_p8, 1, 0 }
  0x12   : > { %p686_p9 = pneg %p1044_p8  ;;  %s30_s7 = ssub.s32 %s947_s21, %s1060_s30 }
  0x13   : > { %s759_s10 = scalar_lea.hbm %s1317_s1, 512 }
  0x14   : > { %p1055_p11 = pnand %p686_p9, %p1322_p1  ;;  %p760_p12 = scmp.ne.s32.totalorder %s1317_s1, %s759_s10 }
  0x15   : > { %p766_p5 = scmp.lt.u32.totalorder %s759_s10, %s1317_s1 }
  0x16   : > { %p761_p13 = pneg %p1055_p11 }
  0x18   : > { %p762_p0 = pnand %p761_p13, %p760_p12 }
  0x1a   : > { %p763_p3 = pneg %p762_p0 }
  0x1c   : > { %p768_p7 = pnand %p766_p5, %p763_p3 }
  0x1e   : > { %771 = shalt.err (!%p768_p7)
}
  0x1f   : > { %s772_s15 = scalar_lea.vmem %s1048_s28, 512  ;;  %p780_p2 = scmp.lt.s32.totalorder %s1048_s28, %s1048_s28 }
  0x20   : > { %p773_p9 = scmp.ne.s32.totalorder %s1048_s28, %s772_s15  ;;  %p781_p6 = scmp.lt.s32.totalorder %s772_s15, %s772_s15 }
  0x22   : > { %p775_p10 = pnand %p773_p9, %p761_p13  ;;  %p782_p4 = por %p781_p6, %p780_p2 }
  0x24   : > { %p776_p1 = pneg %p775_p10 }
  0x26   : > { %p783_p8 = pnand %p782_p4, %p776_p1 }
  0x28   : > { %786 = shalt.err (!%p783_p8)
}
  0x29   : > { %s950_s16 = smov 128   ;;  %s951_s17 = smov 8  }
  0x2a   : > { %689 = dma.hbm_to_vmem [thread:$0]  (!%p1055_p11), %s1317_s1, 512, %s1048_s28, [#allocation6], %s950_s16, %s950_s16, %s951_s17  }
  0x2b   : > { %p31_p2 = scmp.eq.s32.totalorder %s30_s7, 0  ;;  %p40_p1 = scmp.ne.s32.totalorder %s943_s20, %s939_s19 }
  0x2c   : > { %p41_p4 = scmp.eq.s32.totalorder %s947_s21, 0  ;;  %p705_p6 = scmp.lt.s32.totalorder %s947_s21, 2 }
  0x2d   : > { %s1091_s9 = scalar_select %p31_p2, %s943_s20, %s33_s6  }
  0x2e   : > { %p42_p8 = por %p41_p4, %p40_p1  ;;  %p1330_p10 = scmp.eq.s32.totalorder %s1023_s22, 1 }
  0x2f   : > { %s206_s11 = sand.u32 1, %s943_s20   ;;  %s620_s12 = sshll.u32 %s947_s21, 7 }
  0x30   : > { %p1095_p12 = por %p1330_p10, %p40_p1  ;;  %s619_s13 = sshll.u32 %s206_s11, 3 }
  0x31   : > { %s1104_s15 = scalar_lea.hbm %s1316_s0, %s620_s12  ;;  %s210_s28 = scalar_lea.vmem [#allocation2], %s619_s13 }
  0x32   : > { %s217_s6 = sshll.u32 %s210_s28, 4  ;;  %p1106_p11 = pnand %p705_p6, %p42_p8  ;;  %s1110_s6 = int_to_ptr.vmem [resolvable:$true] %s217_s6 }
  0x33   : > { %s207_s16 = scalar_lea.sflag [#allocation3], %s206_s11  ;;  %s787_s17 = scalar_lea.hbm %s1104_s15, 128 }
  0x34   : > { %p788_p13 = scmp.ne.s32.totalorder %s1104_s15, %s787_s17  ;;  %p789_p0 = pneg %p1106_p11 }
  0x35   : > { %s792_s12 = scalar_lea.hbm %s1316_s0, 256  ;;  %p793_p7 = scmp.lt.u32.totalorder %s1104_s15, %s1316_s0 }
  0x36   : > { %p790_p3 = pnand %p789_p0, %p788_p13  ;;  %p794_p9 = scmp.lt.u32.totalorder %s792_s12, %s787_s17 }
  0x37   : > { %p796_p1 = scmp.lt.u32.totalorder %s787_s17, %s1104_s15 }
  0x38   : > { %p791_p5 = pneg %p790_p3  ;;  %p795_p2 = por %p794_p9, %p793_p7 }
  0x3a   : > { %p797_p4 = por %p796_p1, %p795_p2 }
  0x3c   : > { %p798_p6 = pnand %p797_p4, %p791_p5 }
  0x3e   : > { %801 = shalt.err (!%p798_p6)
}
  0x3f   : > { %s802_s11 = scalar_lea.vmem %s1110_s6, 128  ;;  %s952_s14 = smov [#allocation2]  }
  0x40   : > { %p803_p8 = scmp.ne.s32.totalorder %s1110_s6, %s802_s11  ;;  %s807_s28 = sshll.u32 %s952_s14, 4  ;;  %s808_s28 = int_to_ptr.vmem [resolvable:$false] %s807_s28 }
  0x41   : > { %s809_s27 = scalar_lea.vmem %s808_s28, 256  ;;  %p810_p3 = scmp.lt.s32.totalorder %s1110_s6, %s808_s28 }
  0x42   : > { %p805_p10 = pnand %p803_p8, %p789_p0  ;;  %p811_p7 = scmp.lt.s32.totalorder %s809_s27, %s802_s11 }
  0x44   : > { %p806_p13 = pneg %p805_p10  ;;  %p812_p9 = por %p811_p7, %p810_p3 }
  0x46   : > { %p813_p2 = pnand %p812_p9, %p806_p13 }
  0x48   : > { %816 = shalt.err (!%p813_p2)
}
  0x49   : > { %693 = dma.hbm_to_vmem [thread:$0]  (!%p1106_p11), %s1104_s15, 128, %s1110_s6, %s207_s16  }
  0x4a   : > { %p1333_p5 = scmp.ne.s32.totalorder %s1328_s26, 0 }
  0x4b   : > { %s1140_s17 = sand.u32 (!%p1333_p5), 1, %s939_s19   ;;  %p1334_p0 = scmp.ne.s32.totalorder (!%p1333_p5), %s1326_s24, 0 }
  0x4c   : > { %226 = sbr.rel (%p1333_p5) target bundleno = 492 (0x1ec), region = 32  ;;  %s622_s8 = sshll.u32 (!%p1333_p5), %s1140_s17, 3 }
  0x4d   : > { %s229_s12 = scalar_lea.sflag (!%p1333_p5), [#allocation3], %s1140_s17  ;;  %s232_s13 = scalar_lea.vmem (!%p1333_p5), [#allocation2], %s622_s8 }
  0x53   : > { %918 = dma.done.wait (%p1334_p0), %s229_s12, 128  }
  0x54   : > { %920 = vsyncadd (%p1334_p0), %s229_s12, 4294967168  ;;  %p1335_p1 = scmp.eq.s32.totalorder %s1023_s22, 0 }
  0x56   : > { %922 = dma.done.wait (%p1335_p1), [#allocation6], 512   ;;  %p1336_p11 = pmov %p1335_p1 }
  0x57   : > { %v953_v0 = vmov 0.0|0.0   ;;  %vm954_vm0 = vmmov 0   ;;  %v955_v1 = vmov 0.0   ;;  %v274_v2 = vld [vmem:[#allocation5] sm:$0xff]  ;;  %v275_v3 = vld [vmem:[#allocation5 + $0x8] sm:$0xff]  ;;  %v276_v4 = vld [vmem:[#allocation5 + $0x10] sm:$0xff] }
  0x58   : > { %924 = vsyncadd (%p1336_p11), [#allocation6], 4294966784  ;;  %668 = vmatprep.subr.bf16.mxu0 %v953_v0  ;;  %665 = vmatprep.mubr.msk.f32.mxu0 %vm954_vm0, %v955_v1  ;;  %v669_v5 = vpack.c.bf16 %v275_v3, %v274_v2  ;;  %v277_v6 = vld [vmem:[#allocation5 + $0x18] sm:$0xff]  ;;  %vm285_vm1 = vcmask 261120   ;;  %s1153_s24 = sshll.u32 %s1140_s17, 5  ;;  %vm359_vm2 = vcmask 64512  }
  0x59   : > { %v672_v7 = vpack.c.bf16 %v277_v6, %v276_v4  ;;  %v273_v8 = vld [vmem:[%s232_s13] sm:$0xff]  ;;  %s956_s6 = smov 80   ;;  %s957_s7 = smov 96  }
  0x5a   : > { %670 = vmatpush3.bf16.msra.mxu0 %v669_v5  ;;  %v627_v9 = vld [vmem:[%s1318_s2] ss:$0 sm:$0xff]  ;;  %s1159_s16 = scalar_lea.vmem [#allocation7], %s1153_s24  ;;  %s958_s29 = smov 72  }
  0x5b   : > { %671 = vmatprep.subr.bf16.mxu0 %v953_v0  ;;  %s959_s11 = smov 88   ;;  %s960_s14 = smov 120  }
  0x5c   : > { %s961_s28 = smov 64   ;;  %s962_s27 = smov 112  }
  0x5d   : > { %s963_s8 = smov 56   ;;  %s964_s12 = smov 104  }
  0x5e   : > { %673 = vmatpush3.bf16.msra.mxu0 %v672_v7  ;;  %s965_s13 = smov 48   ;;  %s966_s26 = smov 40  }
  0x5f   : > { %s265_s15 = scalar_lea.vmem [#allocation8], %s1153_s24 }
  0x61   : > { %666 = vmatmul.mubr.msk.f32.vlgmr.msra.gmra.mrb[0].mxu0 %vm285_vm1, %v273_v8 }
 0x134   : > { %v355_v10 = vpop.f32.mrb[0].mxu0 }
 0x135   : > { %v356_v11 = vadd.f32 %v627_v9, %v355_v10  ;;  %v667_v12 = vpop.f32.mrb[1].mxu0 }
 0x137   : > { %390 = vrot.lane.b32.xlu1 %v356_v11, %s956_s6  ;;  %362 = vrot.lane.b32.xlu0 %v356_v11, %s957_s7  ;;  %360 = vst.msk [vmem:[%s1159_s16] sm:$0xff] %vm359_vm2, %v356_v11  ;;  %s455_s6 = sshll.u32 %s265_s15, 4  ;;  %s420_s7 = sand.u32 1, %s1023_s22   ;;  %s1168_s6 = int_to_ptr.vmem [resolvable:$true] %s455_s6 }
 0x13b   : > { %405 = vrot.lane.b32.xlu1 %v356_v11, %s958_s29  ;;  %375 = vrot.lane.b32.xlu0 %v356_v11, %s959_s11  ;;  %s1166_s29 = sshll.u32 %s1023_s22, 9  ;;  %s1180_s22 = scalar_lea.sflag [#allocation9], %s420_s7 }
 0x13f   : > { %370 = vrot.lane.b32.xlu1 %v356_v11, %s960_s14  ;;  %366 = vrot.lane.b32.xlu0 %v356_v11, %s961_s28  ;;  %s1176_s28 = scalar_lea.hbm %s1320_s4, %s1166_s29 }
 0x143   : > { %385 = vrot.lane.b32.xlu1 %v356_v11, %s962_s27  ;;  %380 = vrot.lane.b32.xlu0 %v356_v11, %s963_s8  ;;  %s817_s27 = scalar_lea.vmem %s1168_s6, 512  ;;  %s967_s8 = smov [#allocation8]  }
 0x144   : > { %p818_p4 = scmp.ne.s32.totalorder %s1168_s6, %s817_s27 }
 0x146   : > { %p819_p6 = pnand %p818_p4, %p1095_p12 }
 0x147   : > { %400 = vrot.lane.b32.xlu1 %v356_v11, %s964_s12  ;;  %395 = vrot.lane.b32.xlu0 %v356_v11, %s965_s13  ;;  %s821_s12 = sshll.u32 %s967_s8, 4  ;;  %s822_s12 = int_to_ptr.vmem [resolvable:$false] %s821_s12 }
 0x148   : > { %p820_p8 = pneg %p819_p6  ;;  %s823_s13 = scalar_lea.vmem %s822_s12, 1024 }
 0x149   : > { %p824_p10 = scmp.lt.s32.totalorder %s1168_s6, %s822_s12  ;;  %p825_p13 = scmp.lt.s32.totalorder %s823_s13, %s817_s27 }
 0x14b   : > { %410 = vrot.lane.b32.xlu0 %v356_v11, %s966_s26  ;;  %p826_p3 = por %p825_p13, %p824_p10 }
 0x14d   : > { %p827_p7 = pnand %p826_p3, %p820_p8 }
 0x1a9   : > { %v391_v13 = vpop.permute.xlu1 %390  ;;  %v363_v14 = vpop.permute.xlu0 %362 }
 0x1aa   : > { %633 = vst.msk [vmem:[%s265_s15 + $0x10] sm:$0xff] %vm359_vm2, %v391_v13  ;;  %365 = vst.msk [vmem:[%s265_s15] sm:$0xff] %vm359_vm2, %v363_v14 }
 0x1ad   : > { %v406_v15 = vpop.permute.xlu1 %405  ;;  %v376_v16 = vpop.permute.xlu0 %375 }
 0x1ae   : > { %636 = vst.msk [vmem:[%s265_s15 + $0x18] sm:$0xff] %vm359_vm2, %v406_v15  ;;  %630 = vst.msk [vmem:[%s265_s15 + $0x8] sm:$0xff] %vm359_vm2, %v376_v16 }
 0x1af   : > { %830 = shalt.err (!%p827_p7)
}
 0x1b0   : > { %s831_s26 = scalar_lea.hbm %s1176_s28, 512  ;;  %s835_s11 = scalar_lea.hbm %s1320_s4, 1024 }
 0x1b1   : > { %p832_p9 = scmp.ne.s32.totalorder %s1176_s28, %s831_s26  ;;  %p836_p0 = scmp.lt.u32.totalorder %s1176_s28, %s1320_s4 }
 0x1b2   : > { %p837_p1 = scmp.lt.u32.totalorder %s835_s11, %s831_s26  ;;  %p839_p4 = scmp.lt.u32.totalorder %s831_s26, %s1176_s28 }
 0x1b3   : > { %p833_p2 = pnand %p832_p9, %p1095_p12 }
 0x1b4   : > { %p838_p11 = por %p837_p1, %p836_p0 }
 0x1b5   : > { %p834_p5 = pneg %p833_p2 }
 0x1b6   : > { %p840_p6 = por %p839_p4, %p838_p11 }
 0x1b8   : > { %p841_p8 = pnand %p840_p6, %p834_p5 }
 0x1ba   : > { %844 = shalt.err (!%p841_p8)
}
 0x1bb   : > { %s968_s27 = smov 128   ;;  %s969_s12 = smov 8   ;;  %v371_v17 = vpop.permute.xlu1 %370  ;;  %v367_v18 = vpop.permute.xlu0 %366 }
 0x1bc   : > { %681 = dma.vmem_to_hbm [thread:$0]  (%p1095_p12), %s1168_s6, 512, %s1176_s28, %s1180_s22, %s968_s27, %s968_s27, %s969_s12  }
 0x1bd   : > { %629 = vst.msk [vmem:[%s1159_s16 + $0x8] sm:$0xff] %vm359_vm2, %v371_v17  ;;  %s1210_s13 = scalar_lea.vmem [#allocation10], %s1153_s24  ;;  %s439_s26 = sshll.u32 %s1159_s16, 4  ;;  %s1219_s26 = int_to_ptr.vmem [resolvable:$true] %s439_s26 }
 0x1be   : > { %369 = vst.msk [vmem:[%s1210_s13] sm:$0xff] %vm359_vm2, %v367_v18  ;;  %s1225_s24 = scalar_lea.hbm %s1319_s3, %s1166_s29  ;;  %s416_s7 = scalar_lea.sflag [#allocation4], %s1140_s17 }
 0x1bf   : > { %v386_v19 = vpop.permute.xlu1 %385  ;;  %v381_v20 = vpop.permute.xlu0 %380  ;;  %s845_s11 = scalar_lea.vmem %s1219_s26, 512  ;;  %s970_s14 = smov [#allocation7]  }
 0x1c0   : > { %632 = vst.msk [vmem:[%s1159_s16 + $0x10] sm:$0xff] %vm359_vm2, %v386_v19  ;;  %631 = vst.msk [vmem:[%s1210_s13 + $0x8] sm:$0xff] %vm359_vm2, %v381_v20  ;;  %p846_p10 = scmp.ne.s32.totalorder %s1219_s26, %s845_s11  ;;  %s849_s8 = sshll.u32 %s970_s14, 4  ;;  %s850_s8 = int_to_ptr.vmem [resolvable:$false] %s849_s8 }
 0x1c1   : > { %s851_s6 = scalar_lea.vmem %s850_s8, 1024  ;;  %p852_p7 = scmp.lt.s32.totalorder %s1219_s26, %s850_s8 }
 0x1c2   : > { %p847_p13 = pnand %p846_p10, %p1095_p12  ;;  %p853_p9 = scmp.lt.s32.totalorder %s851_s6, %s845_s11 }
 0x1c3   : > { %v401_v21 = vpop.permute.xlu1 %400  ;;  %v396_v22 = vpop.permute.xlu0 %395 }
 0x1c4   : > { %635 = vst.msk [vmem:[%s1159_s16 + $0x18] sm:$0xff] %vm359_vm2, %v401_v21  ;;  %634 = vst.msk [vmem:[%s1210_s13 + $0x10] sm:$0xff] %vm359_vm2, %v396_v22  ;;  %p848_p3 = pneg %p847_p13  ;;  %p854_p2 = por %p853_p9, %p852_p7 }
 0x1c6   : > { %p855_p5 = pnand %p854_p2, %p848_p3 }
 0x1c8   : > { %858 = shalt.err (!%p855_p5)
}
 0x1c9   : > { %s859_s16 = scalar_lea.hbm %s1225_s24, 512  ;;  %s863_s14 = scalar_lea.hbm %s1319_s3, 1024 }
 0x1ca   : > { %p860_p0 = scmp.ne.s32.totalorder %s1225_s24, %s859_s16  ;;  %p864_p4 = scmp.lt.u32.totalorder %s1225_s24, %s1319_s3 }
 0x1cb   : > { %p865_p6 = scmp.lt.u32.totalorder %s863_s14, %s859_s16  ;;  %p867_p10 = scmp.lt.u32.totalorder %s859_s16, %s1225_s24 }
 0x1cc   : > { %p861_p1 = pnand %p860_p0, %p1095_p12 }
 0x1cd   : > { %p866_p8 = por %p865_p6, %p864_p4 }
 0x1ce   : > { %p862_p11 = pneg %p861_p1 }
 0x1cf   : > { %p868_p13 = por %p867_p10, %p866_p8 }
 0x1d1   : > { %p869_p3 = pnand %p868_p13, %p862_p11 }
 0x1d3   : > { %872 = shalt.err (!%p869_p3)
}
 0x1d4   : > { %680 = dma.vmem_to_hbm [thread:$0]  (%p1095_p12), %s1219_s26, 512, %s1225_s24, %s416_s7, %s968_s27, %s968_s27, %s969_s12   ;;  %v411_v23 = vpop.permute.xlu0 %410 }
 0x1d5   : > { %s1337_s23 = sshll.u32 %s1210_s13, 4  ;;  %s1267_s6 = scalar_lea.hbm %s1321_s5, %s1166_s29  ;;  %637 = vst.msk [vmem:[%s1210_s13 + $0x18] sm:$0xff] %vm359_vm2, %v411_v23  ;;  %s1261_s23 = int_to_ptr.vmem [resolvable:$true] %s1337_s23 }
 0x1d6   : > { %s873_s17 = scalar_lea.vmem %s1261_s23, 512  ;;  %s971_s26 = smov [#allocation10]  }
 0x1d7   : > { %p874_p7 = scmp.ne.s32.totalorder %s1261_s23, %s873_s17  ;;  %s877_s24 = sshll.u32 %s971_s26, 4  ;;  %s878_s24 = int_to_ptr.vmem [resolvable:$false] %s877_s24 }
 0x1d8   : > { %s879_s7 = scalar_lea.vmem %s878_s24, 1024  ;;  %p880_p5 = scmp.lt.s32.totalorder %s1261_s23, %s878_s24 }
 0x1d9   : > { %p875_p9 = pnand %p874_p7, %p1095_p12  ;;  %p881_p0 = scmp.lt.s32.totalorder %s879_s7, %s873_s17 }
 0x1db   : > { %p876_p2 = pneg %p875_p9  ;;  %p882_p1 = por %p881_p0, %p880_p5 }
 0x1dd   : > { %p883_p11 = pnand %p882_p1, %p876_p2 }
 0x1df   : > { %886 = shalt.err (!%p883_p11)
}
 0x1e0   : > { %s887_s29 = scalar_lea.hbm %s1267_s6, 512  ;;  %s891_s28 = scalar_lea.hbm %s1321_s5, 1024 }
 0x1e1   : > { %p888_p4 = scmp.ne.s32.totalorder %s1267_s6, %s887_s29  ;;  %p892_p10 = scmp.lt.u32.totalorder %s1267_s6, %s1321_s5 }
 0x1e2   : > { %p893_p13 = scmp.lt.u32.totalorder %s891_s28, %s887_s29  ;;  %p895_p7 = scmp.lt.u32.totalorder %s887_s29, %s1267_s6 }
 0x1e3   : > { %p889_p6 = pnand %p888_p4, %p1095_p12 }
 0x1e4   : > { %p894_p3 = por %p893_p13, %p892_p10 }
 0x1e5   : > { %p890_p8 = pneg %p889_p6 }
 0x1e6   : > { %p896_p9 = por %p895_p7, %p894_p3 }
 0x1e8   : > { %p897_p2 = pnand %p896_p9, %p890_p8 }
 0x1ea   : > { %900 = shalt.err (!%p897_p2)
}
 0x1eb   : > { %682 = dma.vmem_to_hbm [thread:$0]  (%p1095_p12), %s1261_s23, 512, %s1267_s6, %s1180_s22, %s968_s27, %s968_s27, %s969_s12  }
 0x1ec PF: > { %s486_s15 = sand.u32 1, %s935_s18   ;;  %p1338_p5 = scmp.ne.s32.totalorder %s1327_s25, 0 }
 0x1ed   : > { %p1339_p0 = scmp.ge.s32.totalorder %s947_s21, 2  ;;  %s487_s11 = scalar_lea.sflag [#allocation4], %s486_s15 }
 0x1ef   : > { %p695_p1 = pnand %p1339_p0, %p1338_p5 }
 0x1f1   : > { %926 = dma.done.wait (!%p695_p1), %s487_s11, 512  }
 0x1f2   : > { %928 = vsyncadd (!%p695_p1), %s487_s11, 4294966784  ;;  %s1340_s10 = sadd.s32 4294967294, %s947_s21  }
 0x1f3   : > { %s495_s17 = sand.u32 1, %s1340_s10  }
 0x1f4   : > { %s496_s26 = scalar_lea.sflag [#allocation9], %s495_s17 }
 0x1f5   : > { %930 = dma.done.wait (!%p695_p1), %s496_s26, 1024  }
 0x1f6   : > { %932 = vsyncadd (!%p695_p1), %s496_s26, 4294966272  ;;  %p23_p12 = scmp.ge.s32.totalorder %s1060_s30, 4   ;;  %s1341_s18 = smov %s939_s19 }
 0x1f7   : > { %s1342_s19 = smov %s943_s20  ;;  %s1343_s20 = smov %s1091_s9 }
 0x1f8   : > { %s1344_s21 = smov %s1060_s30  ;;  %25 = sbr.rel (!%p23_p12) target bundleno = 8 (0x8), region = 122 }
 0x1ff   :  { %510 = vsyncpa [#allocation3], 1 }
 0x200   :  { %512 = vsyncpa [#allocation3 + $0x1], 1 }
 0x201   :  { %513 = vsyncpa [#allocation6], 1 }
 0x202   :  { %514 = vsyncpa [#allocation4], 1 }
 0x203   :  { %516 = vsyncpa [#allocation4 + $0x1], 1 }
 0x204   :  { %517 = vsyncpa [#allocation9], 1 }
 0x205   :  { %519 = vsyncpa [#allocation9 + $0x1], 1 }

</bundles_post_ra>
